<compile_context>
chip_gen: v6e
topology: v6e:2x2x1
jax: 0.10.0
libtpu: 0.0.40
codegen_flags: <defaults>
</compile_context>

<pallas_src>
from functools import partial

import jax
import jax.numpy as jnp
from jax import lax
from jax.experimental import pallas as pl
from jax.experimental.pallas import tpu as pltpu


ROW_TILE = 128                      # rows per grid step (sublane/lane aligned)
VMEM_LIMIT = 32 * 1024 * 1024       # safe on v5e/v6e/v7x (v7x physical VMEM = 64 MiB)


def _cparams():
    return pltpu.CompilerParams(
        dimension_semantics=("parallel",),
        vmem_limit_bytes=VMEM_LIMIT,
    )


# ---------------------------------------------------------------------------
# Dense (X @ W), optionally row-scaled:  out = diag(s) @ (X @ W)
# ---------------------------------------------------------------------------
def _dense_kernel(x_ref, w_ref, out_ref):
    out_ref[...] = jnp.dot(x_ref[...].astype(jnp.bfloat16),
                           w_ref[...].astype(jnp.bfloat16),
                           preferred_element_type=jnp.float32)


def _dense_scale_kernel(x_ref, w_ref, s_ref, out_ref):
    xw = jnp.dot(x_ref[...].astype(jnp.bfloat16),
                 w_ref[...].astype(jnp.bfloat16),
                 preferred_element_type=jnp.float32)
    out_ref[...] = s_ref[...] * xw


def dense(x, w, row_scale=None, *, tm=ROW_TILE):
    n, f_in = x.shape
    f_out = w.shape[1]
    tm = min(tm, n)
    assert n % tm == 0
    in_specs = [pl.BlockSpec((tm, f_in), lambda i: (i, 0)),
                pl.BlockSpec((f_in, f_out), lambda i: (0, 0))]
    if row_scale is None:
        kernel, args = _dense_kernel, (x, w)
    else:
        in_specs.append(pl.BlockSpec((tm, 1), lambda i: (i, 0)))
        kernel, args = _dense_scale_kernel, (x, w, row_scale)
    return pl.pallas_call(
        kernel,
        grid=(n // tm,),
        in_specs=in_specs,
        out_specs=pl.BlockSpec((tm, f_out), lambda i: (i, 0)),
        out_shape=jax.ShapeDtypeStruct((n, f_out), jnp.float32),
        compiler_params=_cparams(),
    )(*args)


# ---------------------------------------------------------------------------
# SpMM for the ep_net GCN:  out = adj_rowtile @ xw  (+ ReLU)
# ---------------------------------------------------------------------------
def _spmm_kernel(adj_ref, xw_ref, out_ref, *, apply_relu):
    h = jnp.dot(adj_ref[...].astype(jnp.bfloat16),
                xw_ref[...].astype(jnp.bfloat16),
                preferred_element_type=jnp.float32)
    if apply_relu:
        h = jnp.maximum(h, 0.0)
    out_ref[...] = h


def spmm(adj, xw, *, apply_relu, tm=ROW_TILE):
    n = adj.shape[0]
    f_out = xw.shape[1]
    tm = min(tm, n)
    assert n % tm == 0
    return pl.pallas_call(
        partial(_spmm_kernel, apply_relu=apply_relu),
        grid=(n // tm,),
        in_specs=[pl.BlockSpec((tm, n), lambda i: (i, 0)),
                  pl.BlockSpec((n, f_out), lambda i: (0, 0))],
        out_specs=pl.BlockSpec((tm, f_out), lambda i: (i, 0)),
        out_shape=jax.ShapeDtypeStruct((n, f_out), jnp.float32),
        compiler_params=_cparams(),
    )(adj, xw)


# ---------------------------------------------------------------------------
# Global max of relu(Z) @ relu(Z).T without the N^2 matmul:
# by Cauchy-Schwarz (entries >= 0) the max is attained on the diagonal,
# i.e. max == max_i ||relu(Z)_i||^2.
# ---------------------------------------------------------------------------
def _max_logit_kernel(z_ref, out_ref):
    zr = jnp.maximum(z_ref[...], 0.0)
    norms = jnp.sum(zr * zr, axis=1, keepdims=True)          # (N, 1)
    out_ref[...] = jnp.max(norms, axis=0, keepdims=True)     # (1, 1)


def max_logit(z):
    n, e = z.shape
    return pl.pallas_call(
        _max_logit_kernel,
        grid=(1,),
        in_specs=[pl.BlockSpec((n, e), lambda i: (0, 0))],
        out_specs=pl.BlockSpec((1, 1), lambda i: (0, 0)),
        out_shape=jax.ShapeDtypeStruct((1, 1), jnp.float32),
        compiler_params=pltpu.CompilerParams(
            dimension_semantics=("arbitrary",), vmem_limit_bytes=VMEM_LIMIT),
    )(z)


# ---------------------------------------------------------------------------
# Fused: inner-product logits + relaxed-Bernoulli straight-through sample +
#        row degrees (for the later normalization).  Row-tiled over adj rows.
# Noise is pre-symmetrized from its upper triangle, so adj_new(i,j) is local to
# the (row-tile, full-width) block: adj_new = (p + u > 1) with zeroed diagonal,
# exactly equal to triu(hard,1)+triu(hard,1).T of the reference (p is symmetric).
# ---------------------------------------------------------------------------
def _sample_kernel(max_ref, z_rows_ref, z_full_ref, adj_orig_ref, noise_ref,
                   logits_ref, adj_new_ref, dinv_ref, *, alpha, tm):
    zr_rows = jnp.maximum(z_rows_ref[...], 0.0).astype(jnp.bfloat16)
    zr_full = jnp.maximum(z_full_ref[...], 0.0).astype(jnp.bfloat16)
    # logits tile = relu(Z)_rows @ relu(Z).T    (contract the embedding dim)
    logits = lax.dot_general(zr_rows, zr_full, (((1,), (1,)), ((), ())),
                             preferred_element_type=jnp.float32)
    logits_ref[...] = logits

    mx = max_ref[...]                                   # (1, 1)
    mx = jnp.where(mx > 0.0, mx, 1.0)                   # guard all-zero logits (ref would NaN)
    inv = 1.0 / mx                                      # one reciprocal total
    probs = logits * inv
    if alpha != 1.0:
        probs = alpha * probs + (1.0 - alpha) * adj_orig_ref[...]

    # RelaxedBernoulliStraightThrough forward value:
    #   round(sigmoid((logit(p) + logit(u)) / T)) == 1  iff  p + u > 1   (any T > 0)
    # -> no logs / sigmoids needed; temperature cancels for the hard value.
    eps = 1e-7
    p = jnp.clip(probs, eps, 1.0 - eps)
    u = jnp.clip(noise_ref[...], eps, 1.0 - eps)
    hard = jnp.where(p + u > 1.0, 1.0, 0.0)

    n = adj_orig_ref.shape[1]
    row = lax.broadcasted_iota(jnp.int32, (tm, n), 0) + pl.program_id(0) * tm
    col = lax.broadcasted_iota(jnp.int32, (tm, n), 1)
    adj_new = jnp.where(row == col, 0.0, hard)          # zero diagonal (== triu(1)+sym)
    adj_new_ref[...] = adj_new

    deg = jnp.sum(adj_new, axis=1, keepdims=True) + 1.0  # + self-loop; symmetric => d_col == d_row
    dinv_ref[...] = lax.rsqrt(deg)


def sample_adj(z, adj_orig, noise_sym, max_val, *, alpha, tm=ROW_TILE):
    n, e = z.shape
    tm = min(tm, n)
    assert n % tm == 0
    return pl.pallas_call(
        partial(_sample_kernel, alpha=alpha, tm=tm),
        grid=(n // tm,),
        in_specs=[
            pl.BlockSpec((1, 1), lambda i: (0, 0)),     # global max(logits)
            pl.BlockSpec((tm, e), lambda i: (i, 0)),    # Z row tile
            pl.BlockSpec((n, e), lambda i: (0, 0)),     # Z full (small, resident)
            pl.BlockSpec((tm, n), lambda i: (i, 0)),    # adj_orig row tile
            pl.BlockSpec((tm, n), lambda i: (i, 0)),    # symmetric noise row tile
        ],
        out_specs=(
            pl.BlockSpec((tm, n), lambda i: (i, 0)),    # adj_logits
            pl.BlockSpec((tm, n), lambda i: (i, 0)),    # adj_new
            pl.BlockSpec((tm, 1), lambda i: (i, 0)),    # D^-1/2 of (adj_new + I)
        ),
        out_shape=(
            jax.ShapeDtypeStruct((n, n), jnp.float32),
            jax.ShapeDtypeStruct((n, n), jnp.float32),
            jax.ShapeDtypeStruct((n, 1), jnp.float32),
        ),
        compiler_params=_cparams(),
    )(max_val, z, z, adj_orig, noise_sym)


# ---------------------------------------------------------------------------
# nc_net GCN layer with normalization folded in (adj_norm never materialized):
#   adj_norm @ XW = D^-1/2 (A + I) D^-1/2 @ XW
#                 = diag(dinv) @ ( A @ (diag(dinv) @ XW) + diag(dinv) @ XW )
# ---------------------------------------------------------------------------
def _norm_spmm_kernel(adj_ref, xws_full_ref, xws_rows_ref, dinv_rows_ref,
                      out_ref, *, apply_relu):
    h = jnp.dot(adj_ref[...].astype(jnp.bfloat16),
                xws_full_ref[...].astype(jnp.bfloat16),
                preferred_element_type=jnp.float32)
    h = h + xws_rows_ref[...]            # self-loop contribution  (+ I @ D^-1/2 XW)
    h = dinv_rows_ref[...] * h           # left D^-1/2 row scaling
    if apply_relu:
        h = jnp.maximum(h, 0.0)
    out_ref[...] = h


def norm_gcn_layer(adj_new, dinv, x, w, *, apply_relu, tm=ROW_TILE):
    n = adj_new.shape[0]
    xws = dense(x, w, row_scale=dinv)    # D^-1/2 (X @ W), column scaling folded into rows
    f_out = xws.shape[1]
    tm = min(tm, n)
    assert n % tm == 0
    return pl.pallas_call(
        partial(_norm_spmm_kernel, apply_relu=apply_relu),
        grid=(n // tm,),
        in_specs=[
            pl.BlockSpec((tm, n), lambda i: (i, 0)),        # adj_new row tile
            pl.BlockSpec((n, f_out), lambda i: (0, 0)),     # D^-1/2 XW (full)
            pl.BlockSpec((tm, f_out), lambda i: (i, 0)),    # D^-1/2 XW (row tile)
            pl.BlockSpec((tm, 1), lambda i: (i, 0)),        # dinv row tile
        ],
        out_specs=pl.BlockSpec((tm, f_out), lambda i: (i, 0)),
        out_shape=jax.ShapeDtypeStruct((n, f_out), jnp.float32),
        compiler_params=_cparams(),
    )(adj_new, xws, xws, dinv)


# ---------------------------------------------------------------------------
# GAug forward (glue in plain JAX, hot paths in Pallas)
# ---------------------------------------------------------------------------
def gaug_forward(feats, adj, adj_orig, params, noise_sym, *, temperature, alpha):
    del temperature  # cancels in the straight-through (hard) forward value

    # ep_net: 2-layer GCN encoder (bias=False) -> ReLU -> inner product (fused below)
    h = spmm(adj, dense(feats, params["ep_w1"]), apply_relu=True)
    z = spmm(adj, dense(h, params["ep_w2"]), apply_relu=False)

    # global max of relu(Z) @ relu(Z).T  (== max_i ||relu(Z)_i||^2)
    mx = max_logit(z)

    # fused inner product + relaxed-Bernoulli straight-through sample + degrees
    adj_logits, adj_new, dinv = sample_adj(z, adj_orig, noise_sym, mx, alpha=alpha)

    # nc_net: 2-layer GCN classifier on D^-1/2 (adj_new + I) D^-1/2 (zero biases)
    h1 = norm_gcn_layer(adj_new, dinv, feats, params["nc_w1"], apply_relu=True)

    # lane-dense classifier output: pad n_classes to a multiple of 128, slice after
    w2 = params["nc_w2"]
    n_classes = w2.shape[1]
    pad = (-n_classes) % 128
    if pad:
        w2 = jnp.pad(w2, ((0, 0), (0, pad)))
    out_pad = norm_gcn_layer(adj_new, dinv, h1, w2, apply_relu=False)
    output = out_pad[:, :n_classes]

    return output, adj_logits, adj_new


def glorot(key, fan_in, fan_out):
    limit = jnp.sqrt(6.0 / (fan_in + fan_out))
    return jax.random.uniform(key, (fan_in, fan_out), jnp.float32, -limit, limit)


if __name__ == "__main__":
    N = 256            # nodes (multiple of ROW_TILE)
    F = 128            # input feature dim
    GSL_HIDDEN = 128   # conf.gsl['n_hidden']
    GSL_EMBED = 64     # conf.gsl['n_embed']
    NC_HIDDEN = 128    # conf.model['n_hidden']
    N_CLASSES = 8
    TEMPERATURE = 1.0  # conf.gsl['temperature'] (cancels in hard forward value)
    ALPHA = 0.5        # conf.gsl['alpha'] (!= 1 -> add_bernoulli path)

    key = jax.random.PRNGKey(0)
    k_feat, k_adj, k_noise, k1, k2, k3, k4 = jax.random.split(key, 7)

    feats = jax.random.normal(k_feat, (N, F), jnp.float32)

    # synthetic original 0/1 adjacency (symmetric, zero diag)
    a = (jax.random.uniform(k_adj, (N, N)) < 0.05).astype(jnp.float32)
    upper = jnp.triu(a, 1)
    adj_orig = upper + upper.T

    # input adjacency for ep_net: symmetric-normalized adj_orig + I (plain-JAX glue)
    a_loop = adj_orig + jnp.eye(N, dtype=jnp.float32)
    d = jnp.sum(a_loop, axis=1)
    d_is = 1.0 / jnp.sqrt(d)
    adj = d_is[:, None] * a_loop * d_is[None, :]

    # deterministic parameters (glorot uniform; biases are zero -> omitted)
    params = {
        "ep_w1": glorot(k1, F, GSL_HIDDEN),
        "ep_w2": glorot(k2, GSL_HIDDEN, GSL_EMBED),
        "nc_w1": glorot(k3, F, NC_HIDDEN),
        "nc_w2": glorot(k4, NC_HIDDEN, N_CLASSES),
    }

    # Uniform noise for the relaxed-Bernoulli sample.  The reference only consumes
    # the upper triangle (triu(1) then symmetrize), so we symmetrize it here, which
    # lets the sampling kernel be row-tiled without a whole-matrix transpose.
    u = jax.random.uniform(k_noise, (N, N), jnp.float32)
    u_up = jnp.triu(u, 1)
    noise_sym = u_up + u_up.T

    output, adj_logits, adj_new = gaug_forward(
        feats, adj, adj_orig, params, noise_sym,
        temperature=TEMPERATURE, alpha=ALPHA)

    jax.block_until_ready((output, adj_logits, adj_new))
    assert output.shape == (N, N_CLASSES)
    assert adj_logits.shape == (N, N)
    assert adj_new.shape == (N, N)
    print("KERNEL_OK")
</pallas_src>

<mosaic_0001>
module attributes {stable_mosaic.version = 11 : i64} {
  func.func @_dense_kernel(%arg0: i32, %arg1: memref<128x128xf32, #tpu.memory_space<vmem>>, %arg2: memref<128x128xf32, #tpu.memory_space<vmem>>, %arg3: memref<128x128xf32, #tpu.memory_space<vmem>>) attributes {dimension_semantics = [#tpu.dimension_semantics<parallel>], iteration_bounds = array<i64: 2>, scalar_prefetch = 0 : i64, scratch_operands = 0 : i64, tpu.core_type = #tpu.core_type<tc>, window_params = [{transform_indices = @transform_0, window_bounds = array<i64: 128, 128>}, {pipeline_mode = #tpu.pipeline_mode<synchronous>, transform_indices = @transform_1, window_bounds = array<i64: 128, 128>}, {transform_indices = @transform_2, window_bounds = array<i64: 128, 128>}]} {
    %c0 = arith.constant 0 : index
    %c0_0 = arith.constant 0 : index
    %0 = vector.load %arg1[%c0, %c0_0] : memref<128x128xf32, #tpu.memory_space<vmem>>, vector<128x128xf32>
    %1 = arith.truncf %0 : vector<128x128xf32> to vector<128x128xbf16>
    %c0_1 = arith.constant 0 : index
    %c0_2 = arith.constant 0 : index
    %2 = vector.load %arg2[%c0_1, %c0_2] : memref<128x128xf32, #tpu.memory_space<vmem>>, vector<128x128xf32>
    %3 = arith.truncf %2 : vector<128x128xf32> to vector<128x128xbf16>
    %cst = arith.constant dense<0.000000e+00> : vector<128x128xf32>
    %4 = tpu.matmul %1, %3, %cst {dimension_numbers = #tpu.dot_dimension_numbers<[1], [0], [0], [1], [0, 0, 1, 1], [], []>} : vector<128x128xbf16>, vector<128x128xbf16>, vector<128x128xf32> -> vector<128x128xf32>
    %c0_3 = arith.constant 0 : index
    %c0_4 = arith.constant 0 : index
    %5 = vector.load %arg3[%c0_3, %c0_4] : memref<128x128xf32, #tpu.memory_space<vmem>>, vector<128x128xf32>
    tpu.vector_store %arg3[%c0_3, %c0_4], %4 {strides = array<i32>} : memref<128x128xf32, #tpu.memory_space<vmem>>, vector<128x128xf32>,
    return
  }
  func.func @transform_0(%arg0: i32) -> (i32, i32) {
    %c0_i32 = arith.constant 0 : i32
    %c0_i32_0 = arith.constant 0 : i32
    return %arg0, %c0_i32 : i32, i32
  }
  func.func @transform_1(%arg0: i32) -> (i32, i32) {
    %c0_i32 = arith.constant 0 : i32
    %c0_i32_0 = arith.constant 0 : i32
    %c0_i32_1 = arith.constant 0 : i32
    return %c0_i32, %c0_i32_0 : i32, i32
  }
  func.func @transform_2(%arg0: i32) -> (i32, i32) {
    %c0_i32 = arith.constant 0 : i32
    %c0_i32_0 = arith.constant 0 : i32
    return %arg0, %c0_i32 : i32, i32
  }
}

</mosaic_0001>

<bundles_post_ra>
// kernel: tpu_custom_call.1
= control target key start
LH: loop header
LB: loop body
LE: loop exit
PB: predicated region body
PF: predicated region fallthrough
CT: control target
= control target key end

     0   :  { %7 = vsyncpa [#allocation3], 0  ;;  %s951_s0 = inlined_call_operand.hbm [shape: f32[256,128], index: 0, kind: input, shape index: {}]   ;;  %s952_s1 = inlined_call_operand.hbm [shape: f32[128,128], index: 1, kind: input, shape index: {}]   ;;  %s953_s2 = inlined_call_operand.hbm [shape: f32[256,128], index: 2, kind: output, shape index: {}]  }
   0x1   :  { %9 = vsyncpa [#allocation3 + $0x1], 0 }
   0x2   :  { %10 = vsyncpa [#allocation6], 0 }
   0x3   :  { %11 = vsyncpa [#allocation4], 0 }
   0x4   :  { %13 = vsyncpa [#allocation4 + $0x1], 0  ;;  %s727_s9 = smov 0   ;;  %s729_s10 = smov 0  }
   0x5   :  { %s731_s11 = smov 0   ;;  %s733_s12 = smov 0  }
   0x6 LB: > { %s748_s13 = sadd.s32 4294967295, %s703_s12   ;;  %s438_s14 = sadd.s32 4294967294, %s703_s12   ;;  %s703_s12 = sphi %s733_s12, %s975_s12   ;;  %s699_s11 = sphi %s731_s11, %s974_s11   ;;  %s695_s10 = sphi %s729_s10, %s973_s10   ;;  %s691_s9 = sphi %s727_s9, %s972_s9  }
   0x7   : > { %p39_p0 = scmp.ne.s32.totalorder %s695_s10, %s691_s9  ;;  %p954_p1 = scmp.eq.s32.totalorder %s748_s13, 0 }
   0x8   : > { %p90_p3 = scmp.eq.s32.totalorder %s438_s14, 1  ;;  %p439_p5 = scmp.ge.s32.totalorder %s703_s12, 1 }
   0x9   : > { %p757_p4 = por %p954_p1, %p39_p0  ;;  %p97_p7 = scmp.lt.s32.totalorder %s703_s12, 3 }
   0xa   : > { %p762_p6 = por %p90_p3, %p39_p0  ;;  %s705_s18 = smov [#allocation5]  }
   0xb   : > { %s958_s15 = scalar_select %p757_p4, 1, 0 }
   0xc   : > { %s959_s16 = scalar_select %p762_p6, 1, 0 }
   0xd   : > { %p767_p8 = pnand %p439_p5, %p97_p7  ;;  %s109_s19 = sshll.u32 %s705_s18, 4  ;;  %s110_s19 = int_to_ptr.vmem [resolvable:$true] %s109_s19 }
   0xe   : > { %s781_s21 = sadd.s32 1, %s703_s12   ;;  %s26_s22 = sadd.s32 1, %s699_s11 }
   0xf   : > { %s960_s17 = scalar_select %p767_p8, 1, 0 }
  0x10   : > { %p528_p9 = pneg %p767_p8  ;;  %s23_s23 = ssub.s32 %s703_s12, %s781_s21 }
  0x11   : > { %s592_s24 = scalar_lea.vmem %s110_s19, 2048  ;;  %p600_p5 = scmp.lt.s32.totalorder %s110_s19, %s110_s19 }
  0x12   : > { %p776_p11 = pnand %p528_p9, %p954_p1  ;;  %p593_p13 = scmp.ne.s32.totalorder %s110_s19, %s592_s24 }
  0x13   : > { %p601_p7 = scmp.lt.s32.totalorder %s592_s24, %s592_s24 }
  0x14   : > { %p583_p12 = pneg %p776_p11 }
  0x15   : > { %p602_p10 = por %p601_p7, %p600_p5 }
  0x16   : > { %p595_p0 = pnand %p593_p13, %p583_p12 }
  0x18   : > { %p596_p3 = pneg %p595_p0 }
  0x1a   : > { %p603_p2 = pnand %p602_p10, %p596_p3 }
  0x1c   : > { %606 = shalt.err (!%p603_p2)
}
  0x1d   : > { %s706_s25 = smov 128   ;;  %s707_s26 = smov 8  }
  0x1e   : > { %531 = dma.hbm_to_vmem [thread:$0]  (!%p776_p11), %s952_s1, 2048, %s110_s19, [#allocation6], %s706_s25, %s706_s25, %s707_s26  }
  0x1f   : > { %p24_p2 = scmp.eq.s32.totalorder %s23_s23, 0  ;;  %p33_p9 = scmp.ne.s32.totalorder %s699_s11, %s695_s10 }
  0x20   : > { %p34_p10 = scmp.eq.s32.totalorder %s703_s12, 0  ;;  %p541_p12 = scmp.lt.s32.totalorder %s703_s12, 2 }
  0x21   : > { %s801_s29 = scalar_select %p24_p2, %s699_s11, %s26_s22  }
  0x22   : > { %p35_p13 = por %p34_p10, %p33_p9  ;;  %p962_p0 = scmp.eq.s32.totalorder %s748_s13, 1 }
  0x23   : > { %s123_s3 = sand.u32 1, %s699_s11   ;;  %s454_s4 = sshll.u32 %s703_s12, 11 }
  0x24   : > { %p805_p3 = por %p962_p0, %p33_p9  ;;  %s442_s5 = sshll.u32 %s123_s3, 7 }
  0x25   : > { %s814_s8 = scalar_lea.hbm %s951_s0, %s454_s4  ;;  %s127_s14 = scalar_lea.vmem [#allocation2], %s442_s5 }
  0x26   : > { %s963_s30 = scalar_select %p805_p3, 1, 0 }
  0x27   : > { %s134_s18 = sshll.u32 %s127_s14, 4  ;;  %p816_p11 = pnand %p541_p12, %p35_p13  ;;  %s820_s18 = int_to_ptr.vmem [resolvable:$true] %s134_s18 }
  0x28   : > { %s822_s20 = scalar_lea.sflag [#allocation3], %s123_s3  ;;  %s607_s22 = scalar_lea.hbm %s814_s8, 2048 }
  0x29   : > { %p608_p5 = scmp.ne.s32.totalorder %s814_s8, %s607_s22  ;;  %p609_p7 = pneg %p816_p11 }
  0x2a   : > { %s612_s27 = scalar_lea.hbm %s951_s0, 4096  ;;  %p613_p10 = scmp.lt.s32.totalorder %s814_s8, %s951_s0 }
  0x2b   : > { %p610_p2 = pnand %p609_p7, %p608_p5  ;;  %p614_p12 = scmp.lt.s32.totalorder %s612_s27, %s607_s22 }
  0x2d   : > { %p611_p9 = pneg %p610_p2  ;;  %p615_p13 = por %p614_p12, %p613_p10 }
  0x2f   : > { %p616_p0 = pnand %p615_p13, %p611_p9 }
  0x31   : > { %619 = shalt.err (!%p616_p0)
}
  0x32   : > { %s620_s3 = scalar_lea.vmem %s820_s18, 2048  ;;  %s708_s5 = smov [#allocation2]  }
  0x33   : > { %p621_p1 = scmp.ne.s32.totalorder %s820_s18, %s620_s3  ;;  %s625_s6 = sshll.u32 %s708_s5, 4  ;;  %s626_s6 = int_to_ptr.vmem [resolvable:$false] %s625_s6 }
  0x34   : > { %s627_s7 = scalar_lea.vmem %s626_s6, 4096  ;;  %p628_p2 = scmp.lt.s32.totalorder %s820_s18, %s626_s6 }
  0x35   : > { %p623_p6 = pnand %p621_p1, %p609_p7  ;;  %p629_p3 = scmp.lt.s32.totalorder %s627_s7, %s620_s3 }
  0x37   : > { %p624_p5 = pneg %p623_p6  ;;  %p630_p4 = por %p629_p3, %p628_p2 }
  0x39   : > { %p631_p8 = pnand %p630_p4, %p624_p5 }
  0x3b   : > { %634 = shalt.err (!%p631_p8)
}
  0x3c   : > { %535 = dma.hbm_to_vmem [thread:$0]  (!%p816_p11), %s814_s8, 2048, %s820_s18, %s822_s20, %s706_s25, %s706_s25, %s707_s26  }
  0x3d   : > { %p965_p1 = scmp.ne.s32.totalorder %s960_s17, 0 }
  0x3e   : > { %s849_s14 = sand.u32 (!%p965_p1), 1, %s695_s10   ;;  %p966_p4 = scmp.ne.s32.totalorder (!%p965_p1), %s958_s15, 0 }
  0x3f   : > { %146 = sbr.rel (%p965_p1) target bundleno = 328 (0x148), region = 28  ;;  %s446_s22 = sshll.u32 (!%p965_p1), %s849_s14, 7 }
  0x40   : > { %s149_s23 = scalar_lea.sflag (!%p965_p1), [#allocation3], %s849_s14  ;;  %s855_s19 = scalar_lea.vmem (!%p965_p1), [#allocation2], %s446_s22 }
  0x44   : > { %678 = dma.done.wait (%p966_p4), %s149_s23, 2048  }
  0x45   : > { %680 = vsyncadd (%p966_p4), %s149_s23, 4294965248  ;;  %p967_p6 = scmp.eq.s32.totalorder %s748_s13, 0 }
  0x47   : > { %682 = dma.done.wait (%p967_p6), [#allocation6], 2048   ;;  %p968_p8 = pmov %p967_p6 }
  0x48   : > { %v218_v0 = vld [vmem:[#allocation5 + $0x70] sm:$0xff]  ;;  %v219_v1 = vld [vmem:[#allocation5 + $0x78] sm:$0xff]  ;;  %v216_v2 = vld [vmem:[#allocation5 + $0x60] sm:$0xff]  ;;  %s883_s15 = scalar_lea.vmem [#allocation7], %s446_s22  ;;  %s455_s17 = sshll.u32 %s748_s13, 11 }
  0x49   : > { %684 = vsyncadd (%p968_p8), [#allocation6], 4294965248  ;;  %v227_v3 = vpack.c.bf16 %v219_v1, %v218_v0  ;;  %v217_v4 = vld [vmem:[#allocation5 + $0x68] sm:$0xff]  ;;  %v214_v6 = vld [vmem:[#allocation5 + $0x50] sm:$0xff]  ;;  %s355_s25 = sshll.u32 %s883_s15, 4  ;;  %s902_s18 = scalar_lea.hbm %s953_s2, %s455_s17  ;;  %s904_s25 = int_to_ptr.vmem [resolvable:$true] %s355_s25 }
  0x4a   : > { %v226_v5 = vpack.c.bf16 %v217_v4, %v216_v2  ;;  %v215_v7 = vld [vmem:[#allocation5 + $0x58] sm:$0xff]  ;;  %v212_v9 = vld [vmem:[#allocation5 + $0x40] sm:$0xff]  ;;  %v181_v11 = vld [vmem:[%s855_s19 + $0x8] sm:$0xff]  ;;  %s342_s13 = scalar_lea.sflag [#allocation4], %s849_s14  ;;  %s635_s20 = scalar_lea.vmem %s904_s25, 2048 }
  0x4b   : > { %472 = vmatprep.subr.bf16.mxu0 %v227_v3  ;;  %504 = vmatprep.subr.bf16.mxu1 %v227_v3  ;;  %v225_v8 = vpack.c.bf16 %v215_v7, %v214_v6  ;;  %v180_v10 = vld [vmem:[%s855_s19] sm:$0xff]  ;;  %v213_v12 = vld [vmem:[#allocation5 + $0x48] sm:$0xff]  ;;  %v210_v18 = vld [vmem:[#allocation5 + $0x30] sm:$0xff]  ;;  %p636_p3 = scmp.ne.s32.totalorder %s904_s25, %s635_s20  ;;  %p969_p11 = scmp.ne.s32.totalorder %s963_s30, 0 }
  0x4c   : > { %473 = vmatpush3.bf16.msra.mxu0 %v227_v3  ;;  %512 = vmatpush3.bf16.msra.mxu1 %v227_v3  ;;  %v196_v13 = vpack.c.bf16 %v181_v11, %v180_v10  ;;  %v188_v14 = vld [vmem:[%s855_s19 + $0x40] sm:$0xff]  ;;  %v189_v15 = vld [vmem:[%s855_s19 + $0x48] sm:$0xff]  ;;  %v224_v17 = vpack.c.bf16 %v213_v12, %v212_v9  ;;  %v211_v19 = vld [vmem:[#allocation5 + $0x38] sm:$0xff]  ;;  %s709_s24 = smov [#allocation7]  }
  0x4d   : > { %474 = vmatprep.subr.bf16.mxu0 %v226_v5  ;;  %505 = vmatprep.subr.bf16.mxu1 %v226_v5  ;;  %v200_v16 = vpack.c.bf16 %v189_v15, %v188_v14  ;;  %v223_v20 = vpack.c.bf16 %v211_v19, %v210_v18  ;;  %v208_v21 = vld [vmem:[#allocation5 + $0x20] sm:$0xff]  ;;  %v209_v22 = vld [vmem:[#allocation5 + $0x28] sm:$0xff]  ;;  %v206_v24 = vld [vmem:[#allocation5 + $0x10] sm:$0xff]  ;;  %p637_p7 = pnand %p636_p3, %p969_p11  ;;  %s639_s27 = sshll.u32 %s709_s24, 4  ;;  %s640_s27 = int_to_ptr.vmem [resolvable:$false] %s639_s27 }
  0x4e   : > { %488 = vmatprep.mubr.bf16.mxu0 %v196_v13  ;;  %v222_v23 = vpack.c.bf16 %v209_v22, %v208_v21  ;;  %v207_v25 = vld [vmem:[#allocation5 + $0x18] sm:$0xff]  ;;  %v204_v27 = vld [vmem:[#allocation5] sm:$0xff]  ;;  %v205_v28 = vld [vmem:[#allocation5 + $0x8] sm:$0xff]  ;;  %s641_s28 = scalar_lea.vmem %s640_s27, 4096  ;;  %p642_p10 = scmp.lt.s32.totalorder %s904_s25, %s640_s27 }
  0x4f   : > { %496 = vmatprep.mubr.bf16.mxu1 %v200_v16  ;;  %v221_v26 = vpack.c.bf16 %v207_v25, %v206_v24  ;;  %v220_v29 = vpack.c.bf16 %v205_v28, %v204_v27  ;;  %v182_v30 = vld [vmem:[%s855_s19 + $0x10] sm:$0xff]  ;;  %v183_v31 = vld [vmem:[%s855_s19 + $0x18] sm:$0xff]  ;;  %v184_v34 = vld [vmem:[%s855_s19 + $0x20] sm:$0xff]  ;;  %p638_p9 = pneg %p637_p7  ;;  %p643_p12 = scmp.lt.s32.totalorder %s641_s28, %s635_s20 }
  0x50   : > { %475 = vmatpush3.bf16.msra.mxu0 %v226_v5  ;;  %513 = vmatpush3.bf16.msra.mxu1 %v226_v5  ;;  %v190_v32 = vld [vmem:[%s855_s19 + $0x50] sm:$0xff]  ;;  %v191_v33 = vld [vmem:[%s855_s19 + $0x58] sm:$0xff]  ;;  %v185_v35 = vld [vmem:[%s855_s19 + $0x28] sm:$0xff]  ;;  %v197_v38 = vpack.c.bf16 %v183_v31, %v182_v30 }
  0x51   : > { %476 = vmatprep.subr.bf16.mxu0 %v225_v8  ;;  %506 = vmatprep.subr.bf16.mxu1 %v225_v8  ;;  %v192_v36 = vld [vmem:[%s855_s19 + $0x60] sm:$0xff]  ;;  %v193_v37 = vld [vmem:[%s855_s19 + $0x68] sm:$0xff]  ;;  %v201_v39 = vpack.c.bf16 %v191_v33, %v190_v32  ;;  %v198_v40 = vpack.c.bf16 %v185_v35, %v184_v34  ;;  %v186_v42 = vld [vmem:[%s855_s19 + $0x30] sm:$0xff]  ;;  %p644_p13 = por %p643_p12, %p642_p10 }
  0x52   : > { %v202_v41 = vpack.c.bf16 %v193_v37, %v192_v36  ;;  %v187_v43 = vld [vmem:[%s855_s19 + $0x38] sm:$0xff]  ;;  %v194_v44 = vld [vmem:[%s855_s19 + $0x70] sm:$0xff] }
  0x53   : > { %v195_v45 = vld [vmem:[%s855_s19 + $0x78] sm:$0xff]  ;;  %v199_v46 = vpack.c.bf16 %v187_v43, %v186_v42  ;;  %p645_p0 = pnand %p644_p13, %p638_p9 }
  0x54   : > { %477 = vmatpush3.bf16.msra.mxu0 %v225_v8  ;;  %514 = vmatpush3.bf16.msra.mxu1 %v225_v8  ;;  %v203_v47 = vpack.c.bf16 %v195_v45, %v194_v44 }
  0x55   : > { %478 = vmatprep.subr.bf16.mxu0 %v224_v17  ;;  %507 = vmatprep.subr.bf16.mxu1 %v224_v17 }
  0x58   : > { %479 = vmatpush3.bf16.msra.mxu0 %v224_v17  ;;  %515 = vmatpush3.bf16.msra.mxu1 %v224_v17 }
  0x59   : > { %480 = vmatprep.subr.bf16.mxu0 %v223_v20  ;;  %508 = vmatprep.subr.bf16.mxu1 %v223_v20 }
  0x5c   : > { %481 = vmatpush3.bf16.msra.mxu0 %v223_v20  ;;  %516 = vmatpush3.bf16.msra.mxu1 %v223_v20 }
  0x5d   : > { %482 = vmatprep.subr.bf16.mxu0 %v222_v23  ;;  %509 = vmatprep.subr.bf16.mxu1 %v222_v23 }
  0x60   : > { %483 = vmatpush3.bf16.msra.mxu0 %v222_v23  ;;  %517 = vmatpush3.bf16.msra.mxu1 %v222_v23 }
  0x61   : > { %484 = vmatprep.subr.bf16.mxu0 %v221_v26  ;;  %510 = vmatprep.subr.bf16.mxu1 %v221_v26 }
  0x64   : > { %485 = vmatpush3.bf16.msra.mxu0 %v221_v26  ;;  %518 = vmatpush3.bf16.msra.mxu1 %v221_v26 }
  0x65   : > { %486 = vmatprep.subr.bf16.mxu0 %v220_v29  ;;  %511 = vmatprep.subr.bf16.mxu1 %v220_v29 }
  0x68   : > { %487 = vmatpush3.bf16.msra.mxu0 %v220_v29  ;;  %519 = vmatpush3.bf16.msra.mxu1 %v220_v29 }
  0x6b   : > { %489 = vmatmul.mubr.bf16.vlgmr.msra.gmra.mxu0 %v197_v38  ;;  %497 = vmatmul.mubr.bf16.vlgmr.msra.gmra.mxu1 %v201_v39 }
  0x6c   : > { %492 = vmatprep.mubr.bf16.mxu0 %v198_v40  ;;  %500 = vmatprep.mubr.bf16.mxu1 %v202_v41 }
  0x73   : > { %493 = vmatmul.mubr.bf16.gmra.mxu0 %v199_v46  ;;  %501 = vmatmul.mubr.bf16.gmra.mxu1 %v203_v47 }
 0x12b   : > { %v490_v48 = vpop.f32.mrf.mxu0  ;;  %v498_v49 = vpop.f32.mrf.mxu1 }
 0x12c   : > { %327 = vst [vmem:[%s883_s15 + $0x10] sm:$0xff] %v490_v48  ;;  %335 = vst [vmem:[%s883_s15 + $0x50] sm:$0xff] %v498_v49 }
 0x12d   : > { %v262_v50 = vpop.f32.mrf.mxu0  ;;  %v294_v51 = vpop.f32.mrf.mxu1 }
 0x12e   : > { %325 = vst [vmem:[%s883_s15] sm:$0xff] %v262_v50  ;;  %333 = vst [vmem:[%s883_s15 + $0x40] sm:$0xff] %v294_v51 }
 0x12f   : > { %v491_v52 = vpop.f32.mrf.mxu0  ;;  %v499_v53 = vpop.f32.mrf.mxu1 }
 0x130   : > { %328 = vst [vmem:[%s883_s15 + $0x18] sm:$0xff] %v491_v52  ;;  %336 = vst [vmem:[%s883_s15 + $0x58] sm:$0xff] %v499_v53 }
 0x131   : > { %v265_v54 = vpop.f32.mrf.mxu0  ;;  %v297_v55 = vpop.f32.mrf.mxu1 }
 0x132   : > { %326 = vst [vmem:[%s883_s15 + $0x8] sm:$0xff] %v265_v54  ;;  %334 = vst [vmem:[%s883_s15 + $0x48] sm:$0xff] %v297_v55 }
 0x133   : > { %v494_v56 = vpop.f32.mrf.mxu0  ;;  %v502_v57 = vpop.f32.mrf.mxu1 }
 0x134   : > { %331 = vst [vmem:[%s883_s15 + $0x30] sm:$0xff] %v494_v56  ;;  %339 = vst [vmem:[%s883_s15 + $0x70] sm:$0xff] %v502_v57 }
 0x135   : > { %v278_v58 = vpop.f32.mrf.mxu0  ;;  %v310_v59 = vpop.f32.mrf.mxu1 }
 0x136   : > { %329 = vst [vmem:[%s883_s15 + $0x20] sm:$0xff] %v278_v58  ;;  %337 = vst [vmem:[%s883_s15 + $0x60] sm:$0xff] %v310_v59 }
 0x137   : > { %v495_v60 = vpop.f32.mrf.mxu0  ;;  %v503_v61 = vpop.f32.mrf.mxu1 }
 0x138   : > { %332 = vst [vmem:[%s883_s15 + $0x38] sm:$0xff] %v495_v60  ;;  %340 = vst [vmem:[%s883_s15 + $0x78] sm:$0xff] %v503_v61 }
 0x139   : > { %v281_v62 = vpop.f32.mrf.mxu0  ;;  %v313_v63 = vpop.f32.mrf.mxu1 }
 0x13a   : > { %330 = vst [vmem:[%s883_s15 + $0x28] sm:$0xff] %v281_v62  ;;  %338 = vst [vmem:[%s883_s15 + $0x68] sm:$0xff] %v313_v63 }
 0x13b   : > { %648 = shalt.err (!%p645_p0)
}
 0x13c   : > { %s649_s4 = scalar_lea.hbm %s902_s18, 2048  ;;  %s653_s6 = scalar_lea.hbm %s953_s2, 4096 }
 0x13d   : > { %p650_p5 = scmp.ne.s32.totalorder %s902_s18, %s649_s4  ;;  %p654_p4 = scmp.lt.s32.totalorder %s902_s18, %s953_s2 }
 0x13e   : > { %p655_p6 = scmp.lt.s32.totalorder %s653_s6, %s649_s4 }
 0x13f   : > { %p651_p2 = pnand %p650_p5, %p969_p11 }
 0x140   : > { %p656_p8 = por %p655_p6, %p654_p4 }
 0x141   : > { %p652_p1 = pneg %p651_p2 }
 0x143   : > { %p657_p3 = pnand %p656_p8, %p652_p1 }
 0x145   : > { %660 = shalt.err (!%p657_p3)
}
 0x146   : > { %s710_s23 = smov 128   ;;  %s711_s19 = smov 8  }
 0x147   : > { %526 = dma.vmem_to_hbm [thread:$0]  (%p969_p11), %s904_s25, 2048, %s902_s18, %s342_s13, %s710_s23, %s710_s23, %s711_s19  }
 0x148 PF: > { %s370_s15 = sand.u32 1, %s691_s9   ;;  %p970_p7 = scmp.ne.s32.totalorder %s959_s16, 0 }
 0x149   : > { %p971_p9 = scmp.ge.s32.totalorder %s703_s12, 2  ;;  %s371_s17 = scalar_lea.sflag [#allocation4], %s370_s15 }
 0x14b   : > { %p537_p10 = pnand %p971_p9, %p970_p7 }
 0x14d   : > { %p538_p12 = pneg %p537_p10 }
 0x14f   : > { %686 = dma.done.wait (%p538_p12), %s371_s17, 2048  }
 0x150   : > { %688 = vsyncadd (%p538_p12), %s371_s17, 4294965248  ;;  %p16_p13 = scmp.ge.s32.totalorder %s781_s21, 4   ;;  %s972_s9 = smov %s695_s10 }
 0x151   : > { %s973_s10 = smov %s699_s11  ;;  %s974_s11 = smov %s801_s29 }
 0x152   : > { %s975_s12 = smov %s781_s21  ;;  %18 = sbr.rel (!%p16_p13) target bundleno = 6 (0x6), region = 77 }
 0x157   :  { %376 = vsyncpa [#allocation3], 1 }
 0x158   :  { %378 = vsyncpa [#allocation3 + $0x1], 1 }
 0x159   :  { %379 = vsyncpa [#allocation6], 1 }
 0x15a   :  { %380 = vsyncpa [#allocation4], 1 }
 0x15b   :  { %382 = vsyncpa [#allocation4 + $0x1], 1 }

</bundles_post_ra>
